<compile_context>
chip_gen: v6e
topology: v6e:2x2x1
jax: 0.10.0
libtpu: 0.0.40
codegen_flags: <defaults>
</compile_context>

<pallas_src>
import functools

import jax
import jax.numpy as jnp
from jax.experimental import pallas as pl
from jax.experimental.pallas import tpu as pltpu


def _round_up(x, m):
    return ((x + m - 1) // m) * m


def _cdiv(a, b):
    return -(-a // b)


def _label_smoothing_kernel(logits_ref, tgt_ref, loss_ref, acc_ref, *,
                            smoothing_value, confidence,
                            ignore_index, ignore_pos):
    i = pl.program_id(1)

    @pl.when(i == 0)
    def _init():
        acc_ref[...] = jnp.zeros_like(acc_ref)

    x = logits_ref[...].astype(jnp.float32)             # (TB, V)
    tgt = tgt_ref[...]                                   # (TB, 1) int32
    tb, v = x.shape
    col = jax.lax.broadcasted_iota(jnp.int32, (tb, v), 1)

    # Max-shifted logits: everything below is computed on (x - m), which is
    # algebraically identical to the unshifted form but well conditioned.
    m = jnp.max(x, axis=-1, keepdims=True)               # (TB, 1)
    xs = x - m                                           # (TB, V)
    lse_s = jnp.log(jnp.sum(jnp.exp(xs), axis=-1, keepdims=True))   # lse - m

    row_sum_s = jnp.sum(xs, axis=-1, keepdims=True)                              # (TB, 1)
    x_tgt_s = jnp.sum(jnp.where(col == tgt, xs, 0.0), axis=-1, keepdims=True)    # xs[row, tgt]
    # Static slice of the ignore column: no full-width compare/select/reduce.
    x_ign_s = logits_ref[:, ignore_pos:ignore_pos + 1].astype(jnp.float32) - m   # (TB, 1)

    # model_prob (PyTorch order): fill smoothing -> zero ignore_pos column ->
    # scatter confidence at tgt -> zero rows with tgt == ignore_index.
    # Algebraic equivalents (no (TB, V) prob materialization):
    coef_tgt = confidence - jnp.where(tgt == ignore_pos, 0.0, smoothing_value)   # (TB, 1)
    dot_px_s = (smoothing_value * row_sum_s
                - smoothing_value * x_ign_s
                + coef_tgt * x_tgt_s)                    # sum_j prob_j * (x_j - m)
    prob_row_sum = smoothing_value * (v - 1) + coef_tgt  # sum_j prob_j

    # sum_j prob_j * logp_j  with  logp_j = (x_j - m) - (lse - m)
    row_loss = dot_px_s - lse_s * prob_row_sum
    row_loss = jnp.where(tgt == ignore_index, 0.0, row_loss)   # masked_fill rows

    # Per-row accumulation; the cross-sublane reduce happens only in finalize.
    acc_ref[...] += row_loss

    @pl.when(i == pl.num_programs(1) - 1)
    def _finalize():
        # Lane-dense (1, 8, 128) output block per core; wrapper reads [c, 0, 0].
        loss_ref[...] = jnp.zeros(loss_ref.shape, jnp.float32) + jnp.sum(acc_ref[...])


def label_smoothing_loss(output, target, *, label_smoothing, tgt_vocab_size,
                         ignore_index=-100, block_rows=None):
    """output: (B, V) float (f32 or bf16); target: (B,) int. Returns scalar f32."""
    assert 0.0 < label_smoothing <= 1.0
    assert tgt_vocab_size > 2
    B, V = output.shape
    assert V == tgt_vocab_size

    smoothing_value = label_smoothing / (tgt_vocab_size - 2)
    confidence = 1.0 - label_smoothing
    # PyTorch `one_hot[ignore_index] = 0` wraps negative indices modulo V.
    ignore_pos = ignore_index % tgt_vocab_size

    itemsize = jnp.dtype(output.dtype).itemsize
    # Per-row VMEM cost: double-buffered input block + (conservatively) ~5 f32
    # full-width temps (f32 cast, xs, exp(xs), iota, select).
    bytes_per_row = V * (2 * itemsize + 5 * 4)
    if block_rows is None:
        budget = 30 << 20                         # ~30 MiB working-set target
        tb = max(8, (budget // max(bytes_per_row, 1)) // 8 * 8)
    else:
        tb = max(8, (int(block_rows) // 8) * 8)
    tb = min(tb, _round_up(B, 8))

    n_blocks = _cdiv(B, tb)
    num_cores = 2 if n_blocks >= 2 else 1          # megacore split on v7x
    steps = _cdiv(n_blocks, num_cores)             # batch tiles per core
    B_pad = num_cores * steps * tb

    tgt2d = target.astype(jnp.int32).reshape(B, 1)
    if B_pad != B:
        pad = B_pad - B
        # Padded rows get target == ignore_index -> they contribute exactly 0.
        output = jnp.pad(output, ((0, pad), (0, 0)))
        tgt2d = jnp.pad(tgt2d, ((0, pad), (0, 0)), constant_values=ignore_index)

    kernel = functools.partial(
        _label_smoothing_kernel,
        smoothing_value=float(smoothing_value),
        confidence=float(confidence),
        ignore_index=int(ignore_index),
        ignore_pos=int(ignore_pos),
    )

    vmem_need = tb * bytes_per_row + tb * 8 + 2 * 8 * 128 * 4
    vmem_limit = int(min(max(vmem_need + (2 << 20), 32 << 20), 48 << 20))

    cost = pl.CostEstimate(
        flops=int(8 * B_pad * V),
        transcendentals=int(B_pad * V),
        bytes_accessed=int(B_pad * V * itemsize + B_pad * 4
                           + num_cores * 8 * 128 * 4),
    )

    partial_out = pl.pallas_call(
        kernel,
        out_shape=jax.ShapeDtypeStruct((num_cores, 8, 128), jnp.float32),
        grid_spec=pltpu.PrefetchScalarGridSpec(
            num_scalar_prefetch=0,
            grid=(num_cores, steps),
            in_specs=[
                pl.BlockSpec((tb, V), lambda c, i: (c * steps + i, 0)),   # logits tile
                pl.BlockSpec((tb, 1), lambda c, i: (c * steps + i, 0)),   # targets tile
            ],
            out_specs=pl.BlockSpec((1, 8, 128), lambda c, i: (c, 0, 0)),
            scratch_shapes=[pltpu.VMEM((tb, 1), jnp.float32)],
        ),
        compiler_params=pltpu.CompilerParams(
            dimension_semantics=("parallel", "arbitrary"),
            vmem_limit_bytes=vmem_limit),
        cost_estimate=cost,
    )(output, tgt2d)

    # Combine per-core partial sums; negate and mean-over-batch in the wrapper.
    return -jnp.sum(partial_out[:, 0, 0]) / float(B)


def _reference(output, target, *, label_smoothing, tgt_vocab_size,
               ignore_index=-100):
    """Pure-JAX reference mirroring the PyTorch forward."""
    B, V = output.shape
    smoothing_value = label_smoothing / (tgt_vocab_size - 2)
    confidence = 1.0 - label_smoothing
    ignore_pos = ignore_index % tgt_vocab_size

    logp = jax.nn.log_softmax(output.astype(jnp.float32), axis=-1)
    one_hot = jnp.full((V,), smoothing_value, jnp.float32).at[ignore_pos].set(0.0)
    prob = jnp.tile(one_hot[None, :], (B, 1))
    prob = prob.at[jnp.arange(B), target % V].set(confidence)
    prob = jnp.where((target == ignore_index)[:, None], 0.0, prob)
    return -1.0 * jnp.sum(logp * prob) / B


if __name__ == "__main__":
    key = jax.random.PRNGKey(0)
    V = 128                       # tgt_vocab_size (>=100 so ignore_index=-100 wraps like torch)
    label_smoothing = 0.1
    ignore_index = -100
    ignore_pos = ignore_index % V  # 28

    # Case 1: multi-tile, 2-core grid (grid=(2,2), tiles of 8 rows, padded).
    B1 = 24
    k1, k2, key = jax.random.split(key, 3)
    out1 = jax.random.normal(k1, (B1, V), dtype=jnp.float32)
    tgt1 = jax.random.randint(k2, (B1,), 0, V, dtype=jnp.int32)
    tgt1 = tgt1.at[3].set(ignore_index)   # ignored row (masked_fill path)
    tgt1 = tgt1.at[5].set(ignore_pos)     # target lands on the wrapped ignore column
    loss1 = jax.block_until_ready(
        label_smoothing_loss(out1, tgt1, label_smoothing=label_smoothing,
                             tgt_vocab_size=V, ignore_index=ignore_index,
                             block_rows=8))
    ref1 = _reference(out1, tgt1, label_smoothing=label_smoothing,
                      tgt_vocab_size=V, ignore_index=ignore_index)
    assert jnp.allclose(loss1, ref1, rtol=1e-5, atol=1e-5), (loss1, ref1)

    # Case 2: batch not a multiple of the tile, default (byte-sized) tile.
    B2 = 10
    k3, k4, key = jax.random.split(key, 3)
    out2 = jax.random.normal(k3, (B2, V), dtype=jnp.float32)
    tgt2 = jax.random.randint(k4, (B2,), 0, V, dtype=jnp.int32)
    tgt2 = tgt2.at[0].set(ignore_index)
    loss2 = jax.block_until_ready(
        label_smoothing_loss(out2, tgt2, label_smoothing=label_smoothing,
                             tgt_vocab_size=V, ignore_index=ignore_index))
    ref2 = _reference(out2, tgt2, label_smoothing=label_smoothing,
                      tgt_vocab_size=V, ignore_index=ignore_index)
    assert jnp.allclose(loss2, ref2, rtol=1e-5, atol=1e-5), (loss2, ref2)

    # Case 3: bf16 logits streamed without wrapper upcast (f32 math in-kernel),
    # also with a large common logit offset to check the shifted formulation.
    out3 = (out1 + 40.0).astype(jnp.bfloat16)
    loss3 = jax.block_until_ready(
        label_smoothing_loss(out3, tgt1, label_smoothing=label_smoothing,
                             tgt_vocab_size=V, ignore_index=ignore_index,
                             block_rows=8))
    ref3 = _reference(out3.astype(jnp.float32), tgt1,
                      label_smoothing=label_smoothing,
                      tgt_vocab_size=V, ignore_index=ignore_index)
    assert jnp.allclose(loss3, ref3, rtol=2e-2, atol=2e-2), (loss3, ref3)

    # Case 4: odd number of tiles across 2 cores (core 1 ends on padded tiles).
    B4 = 100
    k5, k6, key = jax.random.split(key, 3)
    out4 = jax.random.normal(k5, (B4, V), dtype=jnp.float32)
    tgt4 = jax.random.randint(k6, (B4,), 0, V, dtype=jnp.int32)
    tgt4 = tgt4.at[7].set(ignore_index)
    loss4 = jax.block_until_ready(
        label_smoothing_loss(out4, tgt4, label_smoothing=label_smoothing,
                             tgt_vocab_size=V, ignore_index=ignore_index,
                             block_rows=16))
    ref4 = _reference(out4, tgt4, label_smoothing=label_smoothing,
                      tgt_vocab_size=V, ignore_index=ignore_index)
    assert jnp.allclose(loss4, ref4, rtol=1e-5, atol=1e-5), (loss4, ref4)

    print("KERNEL_OK")
</pallas_src>

<mosaic_0001>
module attributes {stable_mosaic.version = 11 : i64} {
  func.func @_label_smoothing_kernel(%arg0: i32, %arg1: i32, %arg2: memref<8x128xf32, #tpu.memory_space<vmem>>, %arg3: memref<8x1xi32, #tpu.memory_space<vmem>>, %arg4: memref<1x8x128xf32, #tpu.memory_space<vmem>>, %arg5: memref<8x1xf32, #tpu.memory_space<vmem>>) attributes {dimension_semantics = [#tpu.dimension_semantics<parallel>, #tpu.dimension_semantics<arbitrary>], iteration_bounds = array<i64: 2, 2>, scalar_prefetch = 0 : i64, scratch_operands = 1 : i64, tpu.core_type = #tpu.core_type<tc>, window_params = [{transform_indices = @transform_0, window_bounds = array<i64: 8, 128>}, {transform_indices = @transform_1, window_bounds = array<i64: 8, 1>}, {transform_indices = @transform_2, window_bounds = array<i64: 1, 8, 128>}]} {
    %c0_i32 = arith.constant 0 : i32
    %0 = arith.cmpi eq, %arg1, %c0_i32 : i32
    %1 = arith.extui %0 : i1 to i32
    %c0_i32_0 = arith.constant 0 : i32
    %2 = arith.cmpi ne, %1, %c0_i32_0 : i32
    scf.if %2 {
      %cst_21 = arith.constant 0.000000e+00 : f32
      %52 = vector.broadcast %cst_21 : f32 to vector<8x1xf32>
      %c0_22 = arith.constant 0 : index
      %c0_23 = arith.constant 0 : index
      %53 = vector.load %arg5[%c0_22, %c0_23] : memref<8x1xf32, #tpu.memory_space<vmem>>, vector<8x1xf32>
      tpu.vector_store %arg5[%c0_22, %c0_23], %52 {strides = array<i32>} : memref<8x1xf32, #tpu.memory_space<vmem>>, vector<8x1xf32>,
    } else {
    }
    %c0 = arith.constant 0 : index
    %c0_1 = arith.constant 0 : index
    %3 = vector.load %arg2[%c0, %c0_1] : memref<8x128xf32, #tpu.memory_space<vmem>>, vector<8x128xf32>
    %c0_2 = arith.constant 0 : index
    %c0_3 = arith.constant 0 : index
    %4 = vector.load %arg3[%c0_2, %c0_3] : memref<8x1xi32, #tpu.memory_space<vmem>>, vector<8x1xi32>
    %5 = tpu.iota {dimensions = array<i32: 1>} : vector<8x128xi32>
    %cst = arith.constant dense<0xFF800000> : vector<8xf32>
    %6 = vector.multi_reduction <maximumf>, %3, %cst [1] : vector<8x128xf32> to vector<8xf32>
    %7 = vector.shape_cast %6 : vector<8xf32> to vector<8x1xf32>
    %8 = vector.broadcast %7 : vector<8x1xf32> to vector<8x128xf32>
    %9 = arith.subf %3, %8 : vector<8x128xf32>
    %10 = math.exp %9 : vector<8x128xf32>
    %cst_4 = arith.constant dense<0.000000e+00> : vector<8xf32>
    %11 = vector.multi_reduction <add>, %10, %cst_4 [1] : vector<8x128xf32> to vector<8xf32>
    %12 = vector.shape_cast %11 : vector<8xf32> to vector<8x1xf32>
    %13 = math.log %12 : vector<8x1xf32>
    %cst_5 = arith.constant dense<0.000000e+00> : vector<8xf32>
    %14 = vector.multi_reduction <add>, %9, %cst_5 [1] : vector<8x128xf32> to vector<8xf32>
    %15 = vector.shape_cast %14 : vector<8xf32> to vector<8x1xf32>
    %16 = vector.broadcast %4 : vector<8x1xi32> to vector<8x128xi32>
    %17 = arith.cmpi eq, %5, %16 : vector<8x128xi32>
    %cst_6 = arith.constant 0.000000e+00 : f32
    %18 = vector.broadcast %cst_6 : f32 to vector<8x128xf32>
    %19 = arith.select %17, %9, %18 : vector<8x128xi1>, vector<8x128xf32>
    %cst_7 = arith.constant dense<0.000000e+00> : vector<8xf32>
    %20 = vector.multi_reduction <add>, %19, %cst_7 [1] : vector<8x128xf32> to vector<8xf32>
    %21 = vector.shape_cast %20 : vector<8xf32> to vector<8x1xf32>
    %c0_8 = arith.constant 0 : index
    %c28 = arith.constant 28 : index
    %22 = vector.load %arg2[%c0_8, %c28] : memref<8x128xf32, #tpu.memory_space<vmem>>, vector<8x1xf32>
    %23 = arith.subf %22, %7 : vector<8x1xf32>
    %c28_i32 = arith.constant 28 : i32
    %24 = vector.broadcast %c28_i32 : i32 to vector<8x1xi32>
    %25 = arith.cmpi eq, %4, %24 : vector<8x1xi32>
    %cst_9 = arith.constant 0.000000e+00 : f32
    %cst_10 = arith.constant 7.93650805E-4 : f32
    %26 = vector.broadcast %cst_9 : f32 to vector<8x1xf32>
    %27 = vector.broadcast %cst_10 : f32 to vector<8x1xf32>
    %28 = arith.select %25, %26, %27 : vector<8x1xi1>, vector<8x1xf32>
    %cst_11 = arith.constant 0.899999976 : f32
    %29 = vector.broadcast %cst_11 : f32 to vector<8x1xf32>
    %30 = arith.subf %29, %28 : vector<8x1xf32>
    %cst_12 = arith.constant 7.93650805E-4 : f32
    %31 = vector.broadcast %cst_12 : f32 to vector<8x1xf32>
    %32 = arith.mulf %31, %15 : vector<8x1xf32>
    %cst_13 = arith.constant 7.93650805E-4 : f32
    %33 = vector.broadcast %cst_13 : f32 to vector<8x1xf32>
    %34 = arith.mulf %33, %23 : vector<8x1xf32>
    %35 = arith.subf %32, %34 : vector<8x1xf32>
    %36 = arith.mulf %30, %21 : vector<8x1xf32>
    %37 = arith.addf %35, %36 : vector<8x1xf32>
    %cst_14 = arith.constant 0.100793652 : f32
    %38 = vector.broadcast %cst_14 : f32 to vector<8x1xf32>
    %39 = arith.addf %38, %30 : vector<8x1xf32>
    %40 = arith.mulf %13, %39 : vector<8x1xf32>
    %41 = arith.subf %37, %40 : vector<8x1xf32>
    %c-100_i32 = arith.constant -100 : i32
    %42 = vector.broadcast %c-100_i32 : i32 to vector<8x1xi32>
    %43 = arith.cmpi eq, %4, %42 : vector<8x1xi32>
    %cst_15 = arith.constant 0.000000e+00 : f32
    %44 = vector.broadcast %cst_15 : f32 to vector<8x1xf32>
    %45 = arith.select %43, %44, %41 : vector<8x1xi1>, vector<8x1xf32>
    %c0_16 = arith.constant 0 : index
    %c0_17 = arith.constant 0 : index
    %46 = vector.load %arg5[%c0_16, %c0_17] : memref<8x1xf32, #tpu.memory_space<vmem>>, vector<8x1xf32>
    %47 = arith.addf %46, %45 : vector<8x1xf32>
    %c0_18 = arith.constant 0 : index
    %c0_19 = arith.constant 0 : index
    %48 = vector.load %arg5[%c0_18, %c0_19] : memref<8x1xf32, #tpu.memory_space<vmem>>, vector<8x1xf32>
    tpu.vector_store %arg5[%c0_18, %c0_19], %47 {strides = array<i32>} : memref<8x1xf32, #tpu.memory_space<vmem>>, vector<8x1xf32>,
    %c1_i32 = arith.constant 1 : i32
    %49 = arith.cmpi eq, %arg1, %c1_i32 : i32
    %50 = arith.extui %49 : i1 to i32
    %c0_i32_20 = arith.constant 0 : i32
    %51 = arith.cmpi ne, %50, %c0_i32_20 : i32
    scf.if %51 {
      %cst_21 = arith.constant 0.000000e+00 : f32
      %52 = vector.broadcast %cst_21 : f32 to vector<1x8x128xf32>
      %c0_22 = arith.constant 0 : index
      %c0_23 = arith.constant 0 : index
      %53 = vector.load %arg5[%c0_22, %c0_23] : memref<8x1xf32, #tpu.memory_space<vmem>>, vector<8x1xf32>
      %54 = vector.shape_cast %53 : vector<8x1xf32> to vector<1x8x1xf32>
      %cst_24 = arith.constant dense<0.000000e+00> : vector<1xf32>
      %55 = vector.multi_reduction <add>, %54, %cst_24 [1, 2] : vector<1x8x1xf32> to vector<1xf32>
      %56 = vector.shape_cast %55 : vector<1xf32> to vector<1x1x1xf32>
      %57 = vector.extract %56[0, 0, 0] : f32 from vector<1x1x1xf32>
      %58 = vector.broadcast %57 : f32 to vector<1x8x128xf32>
      %59 = arith.addf %52, %58 : vector<1x8x128xf32>
      %c0_25 = arith.constant 0 : index
      %c0_26 = arith.constant 0 : index
      %c0_27 = arith.constant 0 : index
      %60 = vector.load %arg4[%c0_25, %c0_26, %c0_27] : memref<1x8x128xf32, #tpu.memory_space<vmem>>, vector<1x8x128xf32>
      tpu.vector_store %arg4[%c0_25, %c0_26, %c0_27], %59 {strides = array<i32>} : memref<1x8x128xf32, #tpu.memory_space<vmem>>, vector<1x8x128xf32>,
    } else {
    }
    return
  }
  func.func @transform_0(%arg0: i32, %arg1: i32) -> (i32, i32) {
    %c2_i32 = arith.constant 2 : i32
    %0 = arith.muli %arg0, %c2_i32 : i32
    %1 = arith.addi %0, %arg1 : i32
    %c0_i32 = arith.constant 0 : i32
    %c0_i32_0 = arith.constant 0 : i32
    return %1, %c0_i32 : i32, i32
  }
  func.func @transform_1(%arg0: i32, %arg1: i32) -> (i32, i32) {
    %c2_i32 = arith.constant 2 : i32
    %0 = arith.muli %arg0, %c2_i32 : i32
    %1 = arith.addi %0, %arg1 : i32
    %c0_i32 = arith.constant 0 : i32
    %c0_i32_0 = arith.constant 0 : i32
    return %1, %c0_i32 : i32, i32
  }
  func.func @transform_2(%arg0: i32, %arg1: i32) -> (i32, i32, i32) {
    %c0_i32 = arith.constant 0 : i32
    %c0_i32_0 = arith.constant 0 : i32
    %c0_i32_1 = arith.constant 0 : i32
    return %arg0, %c0_i32, %c0_i32_0 : i32, i32, i32
  }
}

</mosaic_0001>

<bundles_post_ra>
// kernel: tpu_custom_call.1
= control target key start
LH: loop header
LB: loop body
LE: loop exit
PB: predicated region body
PF: predicated region fallthrough
CT: control target
= control target key end

     0   :  { %7 = vsyncpa [#allocation4], 0  ;;  %s720_s0 = inlined_call_operand.vmem [shape: f32[32,128], index: 0, kind: input, shape index: {}]   ;;  %s721_s1 = inlined_call_operand.vmem [shape: s32[32,1], index: 1, kind: input, shape index: {}]   ;;  %s722_s2 = inlined_call_operand.hbm [shape: f32[2,8,128], index: 2, kind: output, shape index: {}]  }
   0x1   :  { %9 = vsyncpa [#allocation4 + $0x1], 0  ;;  %s585_s9 = smov 0   ;;  %s587_s10 = smov 0  }
   0x2   :  { %s589_s11 = smov 0   ;;  %s591_s12 = smov 0  }
   0x3   :  { %s593_s13 = smov 0   ;;  %s595_s14 = smov 0  }
   0x4   :  { %s597_s15 = smov 0   ;;  %s599_s16 = smov 0  }
   0x5 LB: > { %s367_s17 = sadd.s32 4294967295, %s562_s16   ;;  %s368_s18 = sadd.s32 4294967294, %s562_s16   ;;  %s562_s16 = sphi %s599_s16, %s15_s16   ;;  %s558_s15 = sphi %s597_s15, %s731_s15   ;;  %s554_s14 = sphi %s595_s14, %s730_s14   ;;  %s550_s13 = sphi %s593_s13, %s729_s13   ;;  %s546_s12 = sphi %s591_s12, %s728_s12   ;;  %s542_s11 = sphi %s589_s11, %s727_s11   ;;  %s538_s10 = sphi %s587_s10, %s726_s10   ;;  %s534_s9 = sphi %s585_s9, %s725_s9  }
   0x6   : > { %s24_s19 = sadd.s32 1, %s554_s14  ;;  %s27_s20 = sadd.s32 1, %s558_s15 }
   0x7   : > { %p25_p0 = scmp.ge.s32.totalorder %s24_s19, 2  ;;  %p104_p1 = scmp.ne.s32.totalorder %s542_s11, %s538_s10 }
   0x8   : > { %p105_p2 = scmp.eq.s32.totalorder %s367_s17, 3  ;;  %p110_p4 = scmp.ne.s32.totalorder %s538_s10, %s534_s9 }
   0x9   : > { %s733_s19 = smov (%p25_p0, %s24_s19), 0  ;;  %s735_s20 = smov (!%p25_p0, %s27_s20), %s558_s15 }
   0xa   : > { %p634_p3 = por %p105_p2, %p104_p1  ;;  %p29_p5 = scmp.ge.s32.totalorder %s735_s20, 2 }
   0xb   : > { %p111_p6 = scmp.eq.s32.totalorder %s368_s18, 3  ;;  %p375_p7 = scmp.ge.s32.totalorder %s562_s16, 1 }
   0xc   : > { %p151_p8 = scmp.lt.s32.totalorder %s562_s16, 5  ;;  %s737_s20 = smov (%p29_p5, %s735_s20), 0 }
   0xd   : > { %p644_p9 = por %p111_p6, %p110_p4  ;;  %s91_s23 = ssub.s32 %s558_s15, %s737_s20 }
   0xe   : > { %p152_p10 = pnand %p375_p7, %p151_p8  ;;  %s94_s24 = sadd.s32 1, %s542_s11 }
   0xf   : > { %p92_p11 = scmp.eq.s32.totalorder %s91_s23, 0  ;;  %s177_s26 = sand.u32 (!%p152_p10), 1, %s538_s10  }
  0x10   : > { %155 = sbr.rel (%p152_p10) target bundleno = 811 (0x32b), region = 28  ;;  %s377_s27 = sshll.u32 (!%p152_p10), %s550_s13, 1 }
  0x11   : > { %s652_s25 = scalar_select %p92_p11, %s542_s11, %s94_s24  }
  0x12   : > { %s658_s28 = sshll.u32 (!%p152_p10), %s177_s26, 3  ;;  %s181_s29 = sadd.s32 (!%p152_p10), %s546_s12, %s377_s27 }
  0x13   : > { %p182_p12 = scmp.lt.s32.totalorder (!%p152_p10), %s181_s29, 3  ;;  %s179_s17 = scalar_lea.vmem (!%p152_p10), [#allocation3], %s658_s28 }
  0x14   : > { %p381_p13 = scmp.ne.s32.totalorder (!%p152_p10), %s546_s12, 0 }
  0x15   : > { %s739_s29 = smov (!%p182_p12, %s181_s29), 3 }
  0x16   : > { %s378_s30 = sshll.u32 %s739_s29, 3  ;;  %199 = sbr.rel (%p381_p13) target bundleno = 29 (0x1d), region = 32 }
  0x17   : > { %s185_s5 = scalar_lea.vmem %s720_s0, %s378_s30  ;;  %s193_s8 = scalar_lea.vmem %s721_s1, %s378_s30 }
  0x1b   : > { %vm200_vm0 = vcmask 7168   ;;  %v564_v0 = vmov 0.0  }
  0x1c   : > { %201 = vst.msk [vmem:[#allocation2] sm:$0xff] %vm200_vm0, %v564_v0 }
  0x1d PF: > { %v202_v1 = vld [vmem:[%s185_s5] sm:$0xff]  ;;  %v565_v2 = vmov 0   ;;  %v204_v7 = vlaneseq  ;;  %v566_v12 = vmov 0.0007936508   ;;  %s567_s18 = smov 28   ;;  %s568_s23 = smov 100  }
  0x1e   : > { %206 = vmax.xlane.f32.xlu0 %v202_v1  ;;  %v203_v3 = vld [vmem:[%s193_s8] sm:$0xff]  ;;  %vm251_vm4 = vcmask 7168   ;;  %p382_p0 = scmp.ne.s32.totalorder %s546_s12, 1 }
  0x1f   : > { %465 = vset.pattern.permute.xlu0 %v565_v2  ;;  %v205_v8 = vand.u32 127, %v204_v7  ;;  %vm224_vm2 = vcmp.eq.s32.totalorder %v203_v3, 28  ;;  %vm243_vm3 = vcmp.eq.s32.totalorder %v203_v3, 4294967196 }
  0x20   : > { %v225_v13 = vsel %vm224_vm2, 0.0, %v566_v12 }
  0x21   : > { %v226_v15 = vsub.f32 0.9, %v225_v13 }
  0x23   : > { %v236_v18 = vadd.f32 0.10079365, %v226_v15  ;;  %v249_v30 = vld [vmem:[#allocation2] sm:$0xff] }
  0x34   : > { %218 = vperm.xlu0 %465, %v203_v3  }
  0xa7   : > { %v207_v4 = vpop.xlane.xlu0 %206 }
  0xa8   : > { %v208_v5 = vsub.f32 %v202_v1, %v207_v4 }
  0xaa   : > { %v209_v6 = vmul.f32 1.442695, %v208_v5  ;;  %v228_v24 = vmul.f32 0.0007936508, %v208_v5 }
  0xac   : > { %466 = vpow2.f32 %v209_v6 }
  0xaf   : > { %v219_v9 = vpop.permute.xlu0 %218 }
  0xb0   : > { %vm220_vm1 = vcmp.eq.s32.totalorder %v205_v8, %v219_v9 }
  0xb1   : > { %v221_v11 = vsel %vm220_vm1, %v208_v5, 0.0 }
  0xb9   : > { %v467_v10 = vpop.eup %466 }
  0xba   : > { %211 = vadd.xlane.f32.xlu1 %v467_v10 }
  0xbe   : > { %222 = vadd.xlane.f32.xlu1 %v221_v11 }
  0xc2   : > { %215 = vadd.xlane.f32.xlu1 %v208_v5 }
 0x143   : > { %v212_v14 = vpop.xlane.xlu1 %211 }
 0x144   : > { %468 = vlog2.f32 %v212_v14 }
 0x147   : > { %v223_v16 = vpop.xlane.xlu1 %222 }
 0x148   : > { %v230_v17 = vmul.f32 %v226_v15, %v223_v16 }
 0x14a   : > { %232 = vrot.lane.b32.xlu1 %v230_v17, %s567_s18 }
 0x14b   : > { %v216_v22 = vpop.xlane.xlu1 %215 }
 0x14c   : > { %v227_v23 = vmul.f32 0.0007936508, %v216_v22 }
 0x14e   : > { %v229_v26 = vsub.f32 %v227_v23, %v228_v24 }
 0x151   : > { %v469_v19 = vpop.eup %468 }
 0x152   : > { %v214_v20 = vmul.f32 0.6931472, %v469_v19 }
 0x154   : > { %v237_v21 = vmul.f32 %v236_v18, %v214_v20 }
 0x156   : > { %239 = vrot.lane.b32.xlu1 %v237_v21, %s567_s18 }
 0x1bc   : > { %v233_v25 = vpop.permute.xlu1 %232 }
 0x1bd   : > { %v235_v27 = vadd.f32 %v233_v25, %v229_v26 }
 0x1c8   : > { %v240_v28 = vpop.permute.xlu1 %239 }
 0x1c9   : > { %v242_v29 = vsub.f32 %v235_v27, %v240_v28 }
 0x1cb   : > { %245 = vrot.lane.b32.xlu1 %v242_v29, %s568_s23 }
 0x23d   : > { %v246_v31 = vpop.permute.xlu1 %245  ;;  %256 = sbr.rel (%p382_p0) target bundleno = 788 (0x314), region = 36 }
 0x23e   : > { %v248_v32 = vsel %vm243_vm3, 0.0, %v246_v31 }
 0x23f   : > { %v250_v33 = vadd.f32 %v249_v30, %v248_v32 }
 0x241   : > { %252 = vst.msk [vmem:[#allocation2] sm:$0xff] %vm251_vm4, %v250_v33 }
 0x248   : > { %v257_v34 = vld [vmem:[#allocation2] sm:$0xff] }
 0x249   : > { %v258_v35 = vsel %vm251_vm4, %v257_v34, 0.0 }
 0x24a   : > { %259 = vadd.xlane.f32.xlu0 %v258_v35 }
 0x2d3   : > { %v260_v36 = vpop.xlane.xlu0 %259 }
 0x2d4   : > { %v261_v37 = vrot.slane %v260_v36, 4 }
 0x2d6   : > { %v262_v38 = vadd.f32 %v261_v37, %v260_v36 }
 0x2d8   : > { %v263_v39 = vrot.slane %v262_v38, 2 }
 0x2da   : > { %v264_v40 = vadd.f32 %v263_v39, %v262_v38 }
 0x2dc   : > { %v265_v41 = vrot.slane %v264_v40, 1 }
 0x2de   : > { %v266_v42 = vadd.f32 %v265_v41, %v264_v40 }
 0x2e0   : > { %387 = vpush %v266_v42 }
 0x311   : > { %s388_s24 = spop %387 }
 0x312   : > { %v268_v43 = vstv %s388_s24 }
 0x313   : > { %270 = vst [vmem:[%s179_s17] sm:$0xff] %v268_v43 }
 0x314 PF: > { %s384_s12 = sshll.u32 %s550_s13, 7  ;;  %s285_s3 = sshll.u32 %s179_s17, 4  ;;  %s286_s3 = int_to_ptr.vmem [resolvable:$true] %s285_s3 }
 0x315   : > { %s283_s30 = scalar_lea.hbm %s722_s2, %s384_s12  ;;  %s272_s4 = scalar_lea.sflag [#allocation4], %s177_s26 }
 0x316   : > { %s470_s5 = scalar_lea.vmem %s286_s3, 128  ;;  %s569_s6 = smov [#allocation3]  }
 0x317   : > { %p471_p1 = scmp.ne.s32.totalorder %s286_s3, %s470_s5  ;;  %s474_s7 = sshll.u32 %s569_s6, 4  ;;  %s475_s7 = int_to_ptr.vmem [resolvable:$false] %s474_s7 }
 0x318   : > { %s476_s8 = scalar_lea.vmem %s475_s7, 256  ;;  %p477_p5 = scmp.lt.s32.totalorder %s286_s3, %s475_s7 }
 0x319   : > { %p472_p2 = pnand %p471_p1, %p634_p3  ;;  %p478_p6 = scmp.lt.s32.totalorder %s476_s8, %s470_s5 }
 0x31b   : > { %p473_p4 = pneg %p472_p2  ;;  %p479_p7 = por %p478_p6, %p477_p5 }
 0x31d   : > { %p480_p8 = pnand %p479_p7, %p473_p4 }
 0x31f   : > { %483 = shalt.err (!%p480_p8)
}
 0x320   : > { %s484_s13 = scalar_lea.hbm %s283_s30, 128  ;;  %s488_s17 = scalar_lea.hbm %s722_s2, 256 }
 0x321   : > { %p485_p10 = scmp.ne.s32.totalorder %s283_s30, %s484_s13  ;;  %p489_p13 = scmp.lt.s32.totalorder %s283_s30, %s722_s2 }
 0x322   : > { %p490_p0 = scmp.lt.s32.totalorder %s488_s17, %s484_s13 }
 0x323   : > { %p486_p11 = pnand %p485_p10, %p634_p3 }
 0x324   : > { %p491_p1 = por %p490_p0, %p489_p13 }
 0x325   : > { %p487_p12 = pneg %p486_p11 }
 0x327   : > { %p492_p2 = pnand %p491_p1, %p487_p12 }
 0x329   : > { %495 = shalt.err (!%p492_p2)
}
 0x32a   : > { %389 = dma.vmem_to_hbm [thread:$0]  (%p634_p3), %s286_s3, 128, %s283_s30, %s272_s4  }
 0x32b PF: > { %p395_p4 = scmp.ge.s32.totalorder %s562_s16, 2  ;;  %s297_s24 = sand.u32 1, %s534_s9  }
 0x32c   : > { %s298_s12 = scalar_lea.sflag [#allocation4], %s297_s24 }
 0x32d   : > { %p392_p5 = pnand %p395_p4, %p644_p9 }
 0x32f   : > { %p393_p6 = pneg %p392_p5 }
 0x331   : > { %529 = dma.done.wait (%p393_p6), %s298_s12, 128  }
 0x332   : > { %531 = vsyncadd (%p393_p6), %s298_s12, 4294967168  ;;  %s15_s16 = sadd.s32 1, %s562_s16   ;;  %s725_s9 = smov %s538_s10 }
 0x333   : > { %p12_p7 = scmp.ge.s32.totalorder %s15_s16, 6   ;;  %s726_s10 = smov %s542_s11 }
 0x334   : > { %s727_s11 = smov %s652_s25  ;;  %s728_s12 = smov %s554_s14 }
 0x335   : > { %s729_s13 = smov %s558_s15  ;;  %s730_s14 = smov %s733_s19 }
 0x336   : > { %s731_s15 = smov %s737_s20  ;;  %14 = sbr.rel (!%p12_p7) target bundleno = 5 (0x5), region = 74 }
 0x33b   :  { %303 = vsyncpa [#allocation4], 1 }
 0x33c   :  { %305 = vsyncpa [#allocation4 + $0x1], 1 }

</bundles_post_ra>
